<compile_context>
chip_gen: v7x
topology: tpu7x:2x2x1
jax: 0.10.0
libtpu: 0.0.40
codegen_flags: <defaults>
</compile_context>

<pallas_src>
import jax
import jax.numpy as jnp
from jax.experimental import pallas as pl
from jax.experimental.pallas import tpu as pltpu


def conv_mm_kernel(p_ref, w_ref, b_ref, o_ref):
    """One strip of the im2col'ed conv as a single MXU matmul.

    p_ref: (1, TM, K_total)      strip of im2col patches
    w_ref: (K_total, C_pad)      folded filter, C_out zero-padded to lanes
    b_ref: (1, C_pad)            bias, zero-padded
    o_ref: (1, TM, C_pad)        lane-dense output strip
    """
    acc = jnp.dot(p_ref[0], w_ref[...], preferred_element_type=jnp.float32)
    acc = acc + b_ref[...].astype(jnp.float32)
    o_ref[0] = acc.astype(o_ref.dtype)


def basic_conv(x, w, b, *, stride=1, padding=0, dilation=1, groups=1):
    """x: (B, C_in, H, W) NCHW; w: (C_out, C_in, KH, KW); b: (C_out,).
    Returns (B, C_out, OH, OW), matching nn.Conv2d(..., bias=True)."""
    assert groups == 1, "kernel supports groups=1 only"

    B, C_in, H, W = x.shape
    C_out, _, KH, KW = w.shape
    OH = (H + 2 * padding - dilation * (KH - 1) - 1) // stride + 1
    OW = (W + 2 * padding - dilation * (KW - 1) - 1) // stride + 1
    M = OH * OW
    K_total = KH * KW * C_in

    # ---------------- wrapper-side layout plumbing (not compute) -------------
    # NHWC + zero padding so channels sit on the lane axis.
    x_nhwc = jnp.transpose(x, (0, 2, 3, 1))
    x_pad = jnp.pad(
        x_nhwc, ((0, 0), (padding, padding), (padding, padding), (0, 0)))

    # im2col: concatenate the KH*KW shifted taps along channels -> one big K.
    taps = []
    for kh in range(KH):
        for kw in range(KW):
            h0, w0 = kh * dilation, kw * dilation
            taps.append(
                x_pad[:,
                      h0:h0 + stride * (OH - 1) + 1:stride,
                      w0:w0 + stride * (OW - 1) + 1:stride,
                      :])
    patches = jnp.concatenate(taps, axis=-1).reshape(B, M, K_total)

    # Weights folded to (K_total, C_out) in matching (kh, kw, c_in) order.
    w_mat = jnp.transpose(w, (2, 3, 1, 0)).reshape(K_total, C_out)

    # Lane-dense output: pad C_out up to a multiple of 128.
    LANE = 128
    C_pad = max(LANE, ((C_out + LANE - 1) // LANE) * LANE)
    w_mat = jnp.pad(w_mat, ((0, 0), (0, C_pad - C_out)))
    b_mat = jnp.pad(b.reshape(1, C_out), ((0, 0), (0, C_pad - C_out)))

    # Spatial strip tiling of the M = OH*OW rows.
    if M >= 512:
        TM = 512
    elif M >= 128:
        TM = 128
    else:
        TM = ((M + 7) // 8) * 8
    M_pad = ((M + TM - 1) // TM) * TM
    if M_pad != M:
        patches = jnp.pad(patches, ((0, 0), (0, M_pad - M), (0, 0)))

    grid = (B, M_pad // TM)

    out = pl.pallas_call(
        conv_mm_kernel,
        out_shape=jax.ShapeDtypeStruct((B, M_pad, C_pad), x.dtype),
        grid=grid,
        in_specs=[
            pl.BlockSpec((1, TM, K_total), lambda bb, mm: (bb, mm, 0)),
            pl.BlockSpec((K_total, C_pad), lambda bb, mm: (0, 0)),
            pl.BlockSpec((1, C_pad), lambda bb, mm: (0, 0)),
        ],
        out_specs=pl.BlockSpec((1, TM, C_pad), lambda bb, mm: (bb, mm, 0)),
        compiler_params=pltpu.CompilerParams(
            dimension_semantics=("parallel", "parallel")),
    )(patches, w_mat, b_mat)

    # Strip padding off and return to PyTorch's NCHW.
    out = out[:, :M, :C_out].reshape(B, OH, OW, C_out)
    return jnp.transpose(out, (0, 3, 1, 2))


def basic_conv_ref(x, w, b, *, stride=1, padding=0, dilation=1, groups=1):
    """Pure-JAX reference mirroring nn.Conv2d(..., bias=True)."""
    out = jax.lax.conv_general_dilated(
        x, w,
        window_strides=(stride, stride),
        padding=((padding, padding), (padding, padding)),
        rhs_dilation=(dilation, dilation),
        dimension_numbers=("NCHW", "OIHW", "NCHW"),
        feature_group_count=groups)
    return out + b.reshape(1, -1, 1, 1)


if __name__ == "__main__":
    # BasicConv(in_planes=16, out_planes=32, kernel_size=3, stride=1,
    #           padding=1, dilation=1, groups=1, bias=True)
    B, C_in, C_out, H, W = 2, 16, 32, 16, 16
    K, pad = 3, 1

    key = jax.random.PRNGKey(0)
    kx, kw_, kb = jax.random.split(key, 3)

    x = jax.random.normal(kx, (B, C_in, H, W), dtype=jnp.float32)
    fan_in = C_in * K * K
    w = jax.random.normal(kw_, (C_out, C_in, K, K), dtype=jnp.float32) / jnp.sqrt(
        jnp.float32(fan_in))
    b = jax.random.normal(kb, (C_out,), dtype=jnp.float32) * 0.1

    out = basic_conv(x, w, b, stride=1, padding=pad)
    out = jax.block_until_ready(out)

    ref = basic_conv_ref(x, w, b, stride=1, padding=pad)
    assert out.shape == (B, C_out, H, W)
    assert jnp.allclose(out, ref, atol=1e-4, rtol=1e-4), \
        "mismatch vs pure-JAX reference"

    print("KERNEL_OK")
</pallas_src>

<mosaic_0001>
module attributes {stable_mosaic.version = 11 : i64} {
  func.func @conv_mm_kernel(%arg0: i32, %arg1: i32, %arg2: memref<1x128x144xf32, #tpu.memory_space<vmem>>, %arg3: memref<144x128xf32, #tpu.memory_space<vmem>>, %arg4: memref<1x128xf32, #tpu.memory_space<vmem>>, %arg5: memref<1x128x128xf32, #tpu.memory_space<vmem>>) attributes {dimension_semantics = [#tpu.dimension_semantics<parallel>, #tpu.dimension_semantics<parallel>], iteration_bounds = array<i64: 2, 2>, scalar_prefetch = 0 : i64, scratch_operands = 0 : i64, tpu.core_type = #tpu.core_type<tc>, window_params = [{transform_indices = @transform_0, window_bounds = array<i64: 1, 128, 144>}, {pipeline_mode = #tpu.pipeline_mode<synchronous>, transform_indices = @transform_1, window_bounds = array<i64: 144, 128>}, {pipeline_mode = #tpu.pipeline_mode<synchronous>, transform_indices = @transform_2, window_bounds = array<i64: 1, 128>}, {transform_indices = @transform_3, window_bounds = array<i64: 1, 128, 128>}]} {
    %c0 = arith.constant 0 : index
    %c0_0 = arith.constant 0 : index
    %c0_1 = arith.constant 0 : index
    %0 = vector.load %arg2[%c0, %c0_0, %c0_1] : memref<1x128x144xf32, #tpu.memory_space<vmem>>, vector<1x128x144xf32>
    %1 = vector.shape_cast %0 : vector<1x128x144xf32> to vector<128x144xf32>
    %c0_2 = arith.constant 0 : index
    %c0_3 = arith.constant 0 : index
    %2 = vector.load %arg3[%c0_2, %c0_3] : memref<144x128xf32, #tpu.memory_space<vmem>>, vector<144x128xf32>
    %cst = arith.constant dense<0.000000e+00> : vector<128x128xf32>
    %3 = tpu.matmul %1, %2, %cst {dimension_numbers = #tpu.dot_dimension_numbers<[1], [0], [0], [1], [0, 0, 1, 1], [], []>} : vector<128x144xf32>, vector<144x128xf32>, vector<128x128xf32> -> vector<128x128xf32>
    %c0_4 = arith.constant 0 : index
    %c0_5 = arith.constant 0 : index
    %4 = vector.load %arg4[%c0_4, %c0_5] : memref<1x128xf32, #tpu.memory_space<vmem>>, vector<1x128xf32>
    %5 = vector.broadcast %4 : vector<1x128xf32> to vector<128x128xf32>
    %6 = arith.addf %3, %5 : vector<128x128xf32>
    %c0_6 = arith.constant 0 : index
    %c0_7 = arith.constant 0 : index
    %c0_8 = arith.constant 0 : index
    %7 = vector.load %arg5[%c0_6, %c0_7, %c0_8] : memref<1x128x128xf32, #tpu.memory_space<vmem>>, vector<1x128x128xf32>
    %8 = vector.shape_cast %7 : vector<1x128x128xf32> to vector<128x128xf32>
    %9 = vector.shape_cast %6 : vector<128x128xf32> to vector<1x128x128xf32>
    tpu.vector_store %arg5[%c0_6, %c0_7, %c0_8], %9 {strides = array<i32>} : memref<1x128x128xf32, #tpu.memory_space<vmem>>, vector<1x128x128xf32>,
    return
  }
  func.func @transform_0(%arg0: i32, %arg1: i32) -> (i32, i32, i32) {
    %c0_i32 = arith.constant 0 : i32
    %c0_i32_0 = arith.constant 0 : i32
    return %arg0, %arg1, %c0_i32 : i32, i32, i32
  }
  func.func @transform_1(%arg0: i32, %arg1: i32) -> (i32, i32) {
    %c0_i32 = arith.constant 0 : i32
    %c0_i32_0 = arith.constant 0 : i32
    %c0_i32_1 = arith.constant 0 : i32
    return %c0_i32, %c0_i32_0 : i32, i32
  }
  func.func @transform_2(%arg0: i32, %arg1: i32) -> (i32, i32) {
    %c0_i32 = arith.constant 0 : i32
    %c0_i32_0 = arith.constant 0 : i32
    %c0_i32_1 = arith.constant 0 : i32
    return %c0_i32, %c0_i32_0 : i32, i32
  }
  func.func @transform_3(%arg0: i32, %arg1: i32) -> (i32, i32, i32) {
    %c0_i32 = arith.constant 0 : i32
    %c0_i32_0 = arith.constant 0 : i32
    return %arg0, %arg1, %c0_i32 : i32, i32, i32
  }
}

</mosaic_0001>

<bundles_post_ra>
// kernel: tpu_custom_call.1
= control target key start
LH: loop header
LB: loop body
LE: loop exit
PB: predicated region body
PF: predicated region fallthrough
CT: control target
= control target key end

     0   :  { %8 = vsyncpa [#allocation3], 0  ;;  %s1152_s0 = inlined_call_operand.vmem [shape: f32[2,256,144], index: 0, kind: input, shape index: {}]   ;;  %s1153_s1 = inlined_call_operand.vmem [shape: f32[144,128], index: 1, kind: input, shape index: {}]   ;;  %s1154_s2 = inlined_call_operand.vmem [shape: f32[1,128], index: 2, kind: input, shape index: {}]   ;;  %s1155_s3 = inlined_call_operand.hbm [shape: f32[2,256,128], index: 3, kind: output, shape index: {}]  }
   0x1   :  { %10 = vsyncpa [#allocation3 + $0x1], 0  ;;  %s843_s12 = smov 0   ;;  %s845_s13 = smov 0  }
   0x2   :  { %s847_s14 = smov 0   ;;  %s849_s15 = smov 0  }
   0x3   :  { %s851_s16 = smov 0   ;;  %s853_s17 = smov 0  }
   0x4   :  { %s855_s18 = smov 0   ;;  %s857_s19 = smov 0  }
   0x5 LB: > { %s571_s20 = sadd.s32 4294967295, %s817_s19   ;;  %s572_s21 = sadd.s32 4294967294, %s817_s19   ;;  %s817_s19 = sphi %s857_s19, %s16_s19   ;;  %s813_s18 = sphi %s855_s18, %s1164_s18   ;;  %s809_s17 = sphi %s853_s17, %s1163_s17   ;;  %s805_s16 = sphi %s851_s16, %s1162_s16   ;;  %s801_s15 = sphi %s849_s15, %s1161_s15   ;;  %s797_s14 = sphi %s847_s14, %s1160_s14   ;;  %s793_s13 = sphi %s845_s13, %s1159_s13   ;;  %s789_s12 = sphi %s843_s12, %s1158_s12  }
   0x6   : > { %s25_s22 = sadd.s32 1, %s809_s17  ;;  %s28_s23 = sadd.s32 1, %s813_s18 }
   0x7   : > { %p26_p0 = scmp.ge.s32.totalorder %s25_s22, 2  ;;  %p117_p1 = scmp.ne.s32.totalorder %s797_s14, %s793_s13 }
   0x8   : > { %p118_p2 = scmp.eq.s32.totalorder %s571_s20, 3  ;;  %p123_p5 = scmp.ne.s32.totalorder %s793_s13, %s789_s12 }
   0x9   : > { %s1166_s22 = smov (%p26_p0, %s25_s22), 0  ;;  %s1168_s23 = smov (!%p26_p0, %s28_s23), %s813_s18 }
   0xa   : > { %s103_s24 = ssub.s32 %s809_s17, %s1166_s22  ;;  %p894_p3 = por %p118_p2, %p117_p1 }
   0xb   : > { %p30_p4 = scmp.ge.s32.totalorder %s1168_s23, 2  ;;  %p124_p6 = scmp.eq.s32.totalorder %s572_s21, 3 }
   0xc   : > { %p575_p7 = scmp.ge.s32.totalorder %s817_s19, 1  ;;  %p162_p9 = scmp.lt.s32.totalorder %s817_s19, 5 }
   0xd   : > { %s1170_s23 = smov (%p30_p4, %s1168_s23), 0  ;;  %p903_p8 = por %p124_p6, %p123_p5 }
   0xe   : > { %s102_s27 = ssub.s32 %s813_s18, %s1170_s23  ;;  %s107_s28 = sadd.s32 1, %s797_s14 }
   0xf   : > { %s104_s29 = sor.u32 %s103_s24, %s102_s27  ;;  %p163_p10 = pnand %p575_p7, %p162_p9 }
  0x10   : > { %p105_p11 = scmp.eq.s32.totalorder %s104_s29, 0  ;;  %v235_v0 = vld [vmem:[%s1153_s1] sm:$0xff] (!%p163_p10)  ;;  %v236_v1 = vld [vmem:[%s1153_s1 + $0x8] sm:$0xff] (!%p163_p10)  ;;  %v237_v2 = vld [vmem:[%s1153_s1 + $0x10] sm:$0xff] (!%p163_p10)  ;;  %s924_s10 = sshll.u32 (!%p163_p10), %s801_s15, 4  ;;  %v819_v3 = vmov (!%p163_p10), 0.0|0.0  }
  0x11   : > { %166 = sbr.rel (%p163_p10) target bundleno = 311 (0x137), region = 32  ;;  %p192_p12 = scmp.lt.s32.totalorder (!%p163_p10), %s805_s16, 1  ;;  %604 = vmatprep.subr.bf16.mxu0 (!%p163_p10), %v819_v3  ;;  %631 = vmatprep.subr.bf16.mxu1 (!%p163_p10), %v819_v3  ;;  %v605_v4 = vpack.c.bf16 (!%p163_p10), %v236_v1, %v235_v0  ;;  %v238_v5 = vld [vmem:[%s1153_s1 + $0x18] sm:$0xff] (!%p163_p10)  ;;  %v239_v7 = vld [vmem:[%s1153_s1 + $0x20] sm:$0xff] (!%p163_p10)  ;;  %v240_v8 = vld [vmem:[%s1153_s1 + $0x28] sm:$0xff] (!%p163_p10)  ;;  %vm260_vm0 = vcmask (!%p163_p10), 130048  }
  0x12   : > { %s912_s30 = scalar_select %p105_p11, %s797_s14, %s107_s28  }
  0x13   : > { %p194_p13 = scmp.lt.s32.totalorder (!%p163_p10), %s924_s10, 31  ;;  %606 = vmatpush1.bf16.msra.mxu0 (!%p163_p10), %v605_v4  ;;  %640 = vmatpush1.bf16.msra.mxu1 (!%p163_p10), %v605_v4  ;;  %v608_v6 = vpack.c.bf16 (!%p163_p10), %v238_v5, %v237_v2  ;;  %v611_v9 = vpack.c.bf16 (!%p163_p10), %v240_v8, %v239_v7  ;;  %v241_v10 = vld [vmem:[%s1153_s1 + $0x30] sm:$0xff] (!%p163_p10)  ;;  %v242_v11 = vld [vmem:[%s1153_s1 + $0x38] sm:$0xff] (!%p163_p10)  ;;  %v243_v15 = vld [vmem:[%s1153_s1 + $0x40] sm:$0xff] (!%p163_p10)  ;;  %s188_s8 = sand.u32 (!%p163_p10), 1, %s793_s13  }
  0x14   : > { %607 = vmatprep.subr.bf16.mxu0 (!%p163_p10), %v819_v3  ;;  %632 = vmatprep.subr.bf16.mxu1 (!%p163_p10), %v819_v3  ;;  %v614_v14 = vpack.c.bf16 (!%p163_p10), %v242_v11, %v241_v10  ;;  %v244_v16 = vld [vmem:[%s1153_s1 + $0x48] sm:$0xff] (!%p163_p10)  ;;  %v245_v18 = vld [vmem:[%s1153_s1 + $0x50] sm:$0xff] (!%p163_p10)  ;;  %v246_v19 = vld [vmem:[%s1153_s1 + $0x58] sm:$0xff] (!%p163_p10)  ;;  %s576_s9 = sshll.u32 (!%p163_p10), %s188_s8, 7 }
  0x15   : > { %v617_v17 = vpack.c.bf16 (!%p163_p10), %v244_v16, %v243_v15  ;;  %v620_v20 = vpack.c.bf16 (!%p163_p10), %v246_v19, %v245_v18  ;;  %v247_v21 = vld [vmem:[%s1153_s1 + $0x60] sm:$0xff] (!%p163_p10)  ;;  %v248_v22 = vld [vmem:[%s1153_s1 + $0x68] sm:$0xff] (!%p163_p10)  ;;  %v249_v24 = vld [vmem:[%s1153_s1 + $0x70] sm:$0xff] (!%p163_p10) }
  0x16   : > { %v623_v23 = vpack.c.bf16 (!%p163_p10), %v248_v22, %v247_v21  ;;  %v250_v25 = vld [vmem:[%s1153_s1 + $0x78] sm:$0xff] (!%p163_p10)  ;;  %v251_v27 = vld [vmem:[%s1153_s1 + $0x80] sm:$0xff] (!%p163_p10)  ;;  %v252_v28 = vld [vmem:[%s1153_s1 + $0x88] sm:$0xff] (!%p163_p10) }
  0x17   : > { %609 = vmatpush1.bf16.msra.mxu0 (!%p163_p10), %v608_v6  ;;  %641 = vmatpush1.bf16.msra.mxu1 (!%p163_p10), %v608_v6  ;;  %v626_v26 = vpack.c.bf16 (!%p163_p10), %v250_v25, %v249_v24  ;;  %v629_v29 = vpack.c.bf16 (!%p163_p10), %v252_v28, %v251_v27  ;;  %v1052_v60 = vld [vmem:[%s1154_s2] ss:$0 sm:$0xff] (!%p163_p10) }
  0x18   : > { %s193_s21 = scalar_select %p192_p12, %s805_s16, 1  ;;  %610 = vmatprep.subr.bf16.mxu0 %v819_v3  ;;  %633 = vmatprep.subr.bf16.mxu1 %v819_v3 }
  0x19   : > { %s195_s15 = scalar_select %p194_p13, %s924_s10, 31 }
  0x1a   : > { %s579_s4 = sshll.u32 %s193_s21, 6  ;;  %s1056_s21 = scalar_lea.vmem [#allocation2], %s576_s9 }
  0x1b   : > { %s578_s5 = sshll.u32 %s195_s15, 1  ;;  %612 = vmatpush1.bf16.msra.mxu0 %v611_v9  ;;  %642 = vmatpush1.bf16.msra.mxu1 %v611_v9  ;;  %s486_s27 = sshll.u32 %s1056_s21, 4  ;;  %s1092_s27 = int_to_ptr.vmem [resolvable:$true] %s486_s27 }
  0x1c   : > { %s198_s6 = sadd.s32 %s579_s4, %s578_s5  ;;  %613 = vmatprep.subr.bf16.mxu0 %v819_v3  ;;  %634 = vmatprep.subr.bf16.mxu1 %v819_v3  ;;  %s1100_s4 = scalar_lea.sflag [#allocation3], %s188_s8 }
  0x1d   : > { %s580_s7 = sshll.u32 %s198_s6, 3  ;;  %s723_s5 = scalar_lea.vmem %s1092_s27, 2048 }
  0x1e   : > { %s954_s24 = scalar_lea.vmem %s1152_s0, %s580_s7  ;;  %p724_p0 = scmp.ne.s32.totalorder %s1092_s27, %s723_s5 }
  0x1f   : > { %v204_v12 = vld [vmem:[%s954_s24 + $0x8] sm:$0xff]  ;;  %615 = vmatpush1.bf16.msra.mxu0 %v614_v14  ;;  %643 = vmatpush1.bf16.msra.mxu1 %v614_v14  ;;  %v203_v30 = vld [vmem:[%s954_s24] sm:$0xff]  ;;  %v206_v32 = vld [vmem:[%s954_s24 + $0x18] sm:$0xff]  ;;  %s820_s6 = smov [#allocation2]  }
  0x20   : > { %v220_v13 = vld [vmem:[%s954_s24 + $0x88] sm:$0xff]  ;;  %582 = vmatprep.mubr.msk.f32.mxu0 %vm260_vm0, %v204_v12  ;;  %616 = vmatprep.subr.bf16.mxu0 %v819_v3  ;;  %v219_v31 = vld [vmem:[%s954_s24 + $0x80] sm:$0xff]  ;;  %v222_v33 = vld [vmem:[%s954_s24 + $0x98] sm:$0xff]  ;;  %p725_p1 = pnand %p724_p0, %p894_p3  ;;  %s727_s7 = sshll.u32 %s820_s6, 4  ;;  %s728_s7 = int_to_ptr.vmem [resolvable:$false] %s727_s7 }
  0x21   : > { %590 = vmatprep.mubr.msk.f32.mxu1 %vm260_vm0, %v220_v13  ;;  %635 = vmatprep.subr.bf16.mxu1 %v819_v3  ;;  %v205_v34 = vld [vmem:[%s954_s24 + $0x10] sm:$0xff]  ;;  %v208_v36 = vld [vmem:[%s954_s24 + $0x28] sm:$0xff]  ;;  %v207_v38 = vld [vmem:[%s954_s24 + $0x20] sm:$0xff]  ;;  %s729_s9 = scalar_lea.vmem %s728_s7, 4096  ;;  %p730_p4 = scmp.lt.s32.totalorder %s1092_s27, %s728_s7 }
  0x22   : > { %v221_v35 = vld [vmem:[%s954_s24 + $0x90] sm:$0xff]  ;;  %v224_v37 = vld [vmem:[%s954_s24 + $0xa8] sm:$0xff]  ;;  %v223_v39 = vld [vmem:[%s954_s24 + $0xa0] sm:$0xff]  ;;  %p726_p2 = pneg %p725_p1  ;;  %p731_p5 = scmp.lt.s32.totalorder %s729_s9, %s723_s5 }
  0x23   : > { %618 = vmatpush1.bf16.msra.mxu0 %v617_v17  ;;  %644 = vmatpush1.bf16.msra.mxu1 %v617_v17  ;;  %v210_v40 = vld [vmem:[%s954_s24 + $0x38] sm:$0xff]  ;;  %v209_v42 = vld [vmem:[%s954_s24 + $0x30] sm:$0xff]  ;;  %v212_v44 = vld [vmem:[%s954_s24 + $0x48] sm:$0xff] }
  0x24   : > { %619 = vmatprep.subr.bf16.mxu0 %v819_v3  ;;  %636 = vmatprep.subr.bf16.mxu1 %v819_v3  ;;  %v226_v41 = vld [vmem:[%s954_s24 + $0xb8] sm:$0xff]  ;;  %v225_v43 = vld [vmem:[%s954_s24 + $0xb0] sm:$0xff]  ;;  %v228_v45 = vld [vmem:[%s954_s24 + $0xc8] sm:$0xff]  ;;  %p732_p6 = por %p731_p5, %p730_p4 }
  0x25   : > { %v211_v46 = vld [vmem:[%s954_s24 + $0x40] sm:$0xff]  ;;  %v214_v48 = vld [vmem:[%s954_s24 + $0x58] sm:$0xff]  ;;  %v213_v50 = vld [vmem:[%s954_s24 + $0x50] sm:$0xff] }
  0x26   : > { %v227_v47 = vld [vmem:[%s954_s24 + $0xc0] sm:$0xff]  ;;  %v230_v49 = vld [vmem:[%s954_s24 + $0xd8] sm:$0xff]  ;;  %v229_v51 = vld [vmem:[%s954_s24 + $0xd0] sm:$0xff]  ;;  %p733_p7 = pnand %p732_p6, %p726_p2 }
  0x27   : > { %621 = vmatpush1.bf16.msra.mxu0 %v620_v20  ;;  %645 = vmatpush1.bf16.msra.mxu1 %v620_v20  ;;  %v216_v52 = vld [vmem:[%s954_s24 + $0x68] sm:$0xff]  ;;  %v215_v54 = vld [vmem:[%s954_s24 + $0x60] sm:$0xff]  ;;  %v218_v56 = vld [vmem:[%s954_s24 + $0x78] sm:$0xff] }
  0x28   : > { %622 = vmatprep.subr.bf16.mxu0 %v819_v3  ;;  %637 = vmatprep.subr.bf16.mxu1 %v819_v3  ;;  %v232_v53 = vld [vmem:[%s954_s24 + $0xe8] sm:$0xff]  ;;  %v231_v55 = vld [vmem:[%s954_s24 + $0xe0] sm:$0xff]  ;;  %v234_v57 = vld [vmem:[%s954_s24 + $0xf8] sm:$0xff] }
  0x29   : > { %v217_v58 = vld [vmem:[%s954_s24 + $0x70] sm:$0xff] }
  0x2a   : > { %v233_v59 = vld [vmem:[%s954_s24 + $0xf0] sm:$0xff]  ;;  %s600_s24 = sshll.u32 %s805_s16, 5 }
  0x2b   : > { %624 = vmatpush1.bf16.msra.mxu0 %v623_v23  ;;  %646 = vmatpush1.bf16.msra.mxu1 %v623_v23  ;;  %s483_s15 = sadd.s32 %s600_s24, %s924_s10 }
  0x2c   : > { %625 = vmatprep.subr.bf16.mxu0 %v819_v3  ;;  %638 = vmatprep.subr.bf16.mxu1 %v819_v3  ;;  %s601_s16 = sshll.u32 %s483_s15, 7 }
  0x2d   : > { %s1090_s29 = scalar_lea.hbm %s1155_s3, %s601_s16 }
  0x2f   : > { %627 = vmatpush1.bf16.msra.mxu0 %v626_v26  ;;  %647 = vmatpush1.bf16.msra.mxu1 %v626_v26 }
  0x30   : > { %628 = vmatprep.subr.bf16.mxu0 %v819_v3  ;;  %639 = vmatprep.subr.bf16.mxu1 %v819_v3 }
  0x33   : > { %630 = vmatpush1.bf16.msra.mxu0 %v629_v29  ;;  %648 = vmatpush1.bf16.msra.mxu1 %v629_v29 }
  0x36   : > { %374 = vmatmul.mubr.f32.vlgmr.msra.gmra.mrb[0].mxu0 %v203_v30  ;;  %414 = vmatmul.mubr.f32.vlgmr.msra.gmra.mrb[0].mxu1 %v219_v31 }
  0x37   : > { %583 = vmatprep.mubr.msk.f32.mxu0 %vm260_vm0, %v206_v32  ;;  %591 = vmatprep.mubr.msk.f32.mxu1 %vm260_vm0, %v222_v33 }
  0x3a   : > { %379 = vmatmul.mubr.f32.gmra.mrb[2].mxu0 %v205_v34  ;;  %419 = vmatmul.mubr.f32.gmra.mrb[2].mxu1 %v221_v35 }
  0x3b   : > { %584 = vmatprep.mubr.msk.f32.mxu0 %vm260_vm0, %v208_v36  ;;  %592 = vmatprep.mubr.msk.f32.mxu1 %vm260_vm0, %v224_v37 }
  0x3e   : > { %384 = vmatmul.mubr.f32.gmra.mrb[4].mxu0 %v207_v38  ;;  %424 = vmatmul.mubr.f32.gmra.mrb[4].mxu1 %v223_v39 }
  0x3f   : > { %585 = vmatprep.mubr.msk.f32.mxu0 %vm260_vm0, %v210_v40  ;;  %593 = vmatprep.mubr.msk.f32.mxu1 %vm260_vm0, %v226_v41 }
  0x42   : > { %389 = vmatmul.mubr.f32.gmra.mrb[6].mxu0 %v209_v42  ;;  %429 = vmatmul.mubr.f32.gmra.mrb[6].mxu1 %v225_v43 }
  0x43   : > { %586 = vmatprep.mubr.msk.f32.mxu0 %vm260_vm0, %v212_v44  ;;  %594 = vmatprep.mubr.msk.f32.mxu1 %vm260_vm0, %v228_v45 }
  0x46   : > { %394 = vmatmul.mubr.f32.gmra.mrb[8].mxu0 %v211_v46  ;;  %434 = vmatmul.mubr.f32.gmra.mrb[8].mxu1 %v227_v47 }
  0x47   : > { %587 = vmatprep.mubr.msk.f32.mxu0 %vm260_vm0, %v214_v48  ;;  %595 = vmatprep.mubr.msk.f32.mxu1 %vm260_vm0, %v230_v49 }
  0x4a   : > { %399 = vmatmul.mubr.f32.gmra.mrb[10].mxu0 %v213_v50  ;;  %439 = vmatmul.mubr.f32.gmra.mrb[10].mxu1 %v229_v51 }
  0x4b   : > { %588 = vmatprep.mubr.msk.f32.mxu0 %vm260_vm0, %v216_v52  ;;  %596 = vmatprep.mubr.msk.f32.mxu1 %vm260_vm0, %v232_v53 }
  0x4e   : > { %404 = vmatmul.mubr.f32.gmra.mrb[12].mxu0 %v215_v54  ;;  %444 = vmatmul.mubr.f32.gmra.mrb[12].mxu1 %v231_v55 }
  0x4f   : > { %589 = vmatprep.mubr.msk.f32.mxu0 %vm260_vm0, %v218_v56  ;;  %597 = vmatprep.mubr.msk.f32.mxu1 %vm260_vm0, %v234_v57 }
  0x52   : > { %409 = vmatmul.mubr.f32.gmra.mrb[14].mxu0 %v217_v58  ;;  %449 = vmatmul.mubr.f32.gmra.mrb[14].mxu1 %v233_v59 }
 0x109   : > { %v375_v61 = vpop.f32.mrb[0].mxu0  ;;  %v415_v62 = vpop.f32.mrb[0].mxu1 }
 0x10a   : > { %v376_v63 = vadd.f32 %v1052_v60, %v375_v61  ;;  %v416_v0 = vadd.f32 %v1052_v60, %v415_v62  ;;  %v377_v1 = vpop.f32.mrb[1].mxu0  ;;  %v417_v2 = vpop.f32.mrb[1].mxu1 }
 0x10c   : > { %454 = vst [vmem:[%s1056_s21] sm:$0xff] %v376_v63  ;;  %462 = vst [vmem:[%s1056_s21 + $0x40] sm:$0xff] %v416_v0 }
 0x10d   : > { %v380_v3 = vpop.f32.mrb[2].mxu0  ;;  %v420_v4 = vpop.f32.mrb[2].mxu1 }
 0x10e   : > { %v381_v5 = vadd.f32 %v1052_v60, %v380_v3  ;;  %v421_v6 = vadd.f32 %v1052_v60, %v420_v4  ;;  %v382_v7 = vpop.f32.mrb[3].mxu0  ;;  %v422_v8 = vpop.f32.mrb[3].mxu1 }
 0x110   : > { %455 = vst [vmem:[%s1056_s21 + $0x8] sm:$0xff] %v381_v5  ;;  %463 = vst [vmem:[%s1056_s21 + $0x48] sm:$0xff] %v421_v6 }
 0x111   : > { %v385_v9 = vpop.f32.mrb[4].mxu0  ;;  %v425_v10 = vpop.f32.mrb[4].mxu1 }
 0x112   : > { %v386_v11 = vadd.f32 %v1052_v60, %v385_v9  ;;  %v426_v12 = vadd.f32 %v1052_v60, %v425_v10  ;;  %v387_v13 = vpop.f32.mrb[5].mxu0  ;;  %v427_v14 = vpop.f32.mrb[5].mxu1 }
 0x114   : > { %456 = vst [vmem:[%s1056_s21 + $0x10] sm:$0xff] %v386_v11  ;;  %464 = vst [vmem:[%s1056_s21 + $0x50] sm:$0xff] %v426_v12 }
 0x115   : > { %v390_v15 = vpop.f32.mrb[6].mxu0  ;;  %v430_v16 = vpop.f32.mrb[6].mxu1 }
 0x116   : > { %v391_v17 = vadd.f32 %v1052_v60, %v390_v15  ;;  %v431_v18 = vadd.f32 %v1052_v60, %v430_v16  ;;  %v392_v19 = vpop.f32.mrb[7].mxu0  ;;  %v432_v20 = vpop.f32.mrb[7].mxu1 }
 0x118   : > { %457 = vst [vmem:[%s1056_s21 + $0x18] sm:$0xff] %v391_v17  ;;  %465 = vst [vmem:[%s1056_s21 + $0x58] sm:$0xff] %v431_v18 }
 0x119   : > { %v395_v21 = vpop.f32.mrb[8].mxu0  ;;  %v435_v22 = vpop.f32.mrb[8].mxu1 }
 0x11a   : > { %v396_v23 = vadd.f32 %v1052_v60, %v395_v21  ;;  %v436_v24 = vadd.f32 %v1052_v60, %v435_v22  ;;  %v397_v25 = vpop.f32.mrb[9].mxu0  ;;  %v437_v26 = vpop.f32.mrb[9].mxu1 }
 0x11c   : > { %458 = vst [vmem:[%s1056_s21 + $0x20] sm:$0xff] %v396_v23  ;;  %466 = vst [vmem:[%s1056_s21 + $0x60] sm:$0xff] %v436_v24 }
 0x11d   : > { %v400_v27 = vpop.f32.mrb[10].mxu0  ;;  %v440_v28 = vpop.f32.mrb[10].mxu1 }
 0x11e   : > { %v401_v29 = vadd.f32 %v1052_v60, %v400_v27  ;;  %v441_v30 = vadd.f32 %v1052_v60, %v440_v28  ;;  %v402_v31 = vpop.f32.mrb[11].mxu0  ;;  %v442_v32 = vpop.f32.mrb[11].mxu1 }
 0x120   : > { %459 = vst [vmem:[%s1056_s21 + $0x28] sm:$0xff] %v401_v29  ;;  %467 = vst [vmem:[%s1056_s21 + $0x68] sm:$0xff] %v441_v30 }
 0x121   : > { %v405_v33 = vpop.f32.mrb[12].mxu0  ;;  %v445_v34 = vpop.f32.mrb[12].mxu1 }
 0x122   : > { %v406_v35 = vadd.f32 %v1052_v60, %v405_v33  ;;  %v446_v36 = vadd.f32 %v1052_v60, %v445_v34  ;;  %v407_v37 = vpop.f32.mrb[13].mxu0  ;;  %v447_v38 = vpop.f32.mrb[13].mxu1 }
 0x124   : > { %460 = vst [vmem:[%s1056_s21 + $0x30] sm:$0xff] %v406_v35  ;;  %468 = vst [vmem:[%s1056_s21 + $0x70] sm:$0xff] %v446_v36 }
 0x125   : > { %v410_v39 = vpop.f32.mrb[14].mxu0  ;;  %v450_v40 = vpop.f32.mrb[14].mxu1 }
 0x126   : > { %v411_v41 = vadd.f32 %v1052_v60, %v410_v39  ;;  %v451_v42 = vadd.f32 %v1052_v60, %v450_v40  ;;  %v412_v43 = vpop.f32.mrb[15].mxu0  ;;  %v452_v44 = vpop.f32.mrb[15].mxu1 }
 0x128   : > { %461 = vst [vmem:[%s1056_s21 + $0x38] sm:$0xff] %v411_v41  ;;  %469 = vst [vmem:[%s1056_s21 + $0x78] sm:$0xff] %v451_v42 }
 0x129   : > { %736 = shalt.err (!%p733_p7)
}
 0x12a   : > { %s737_s8 = scalar_lea.hbm %s1090_s29, 2048  ;;  %s741_s21 = scalar_lea.hbm %s1155_s3, 8192 }
 0x12b   : > { %p738_p9 = scmp.ne.s32.totalorder %s1090_s29, %s737_s8  ;;  %p742_p12 = scmp.lt.u32.totalorder %s1090_s29, %s1155_s3 }
 0x12c   : > { %p743_p13 = scmp.lt.u32.totalorder %s741_s21, %s737_s8  ;;  %p745_p1 = scmp.lt.u32.totalorder %s737_s8, %s1090_s29 }
 0x12d   : > { %p739_p10 = pnand %p738_p9, %p894_p3 }
 0x12e   : > { %p744_p0 = por %p743_p13, %p742_p12 }
 0x12f   : > { %p740_p11 = pneg %p739_p10 }
 0x130   : > { %p746_p2 = por %p745_p1, %p744_p0 }
 0x132   : > { %p747_p4 = pnand %p746_p2, %p740_p11 }
 0x134   : > { %750 = shalt.err (!%p747_p4)
}
 0x135   : > { %s821_s16 = smov 128   ;;  %s822_s10 = smov 8  }
 0x136   : > { %649 = dma.vmem_to_hbm [thread:$0]  (%p894_p3), %s1092_s27, 2048, %s1090_s29, %s1100_s4, %s821_s16, %s821_s16, %s822_s10  }
 0x137 PF: > { %p655_p5 = scmp.ge.s32.totalorder %s817_s19, 2  ;;  %s501_s28 = sand.u32 1, %s789_s12  }
 0x138   : > { %s502_s5 = scalar_lea.sflag [#allocation3], %s501_s28 }
 0x139   : > { %p652_p6 = pnand %p655_p5, %p903_p8 }
 0x13b   : > { %784 = dma.done.wait (!%p652_p6), %s502_s5, 2048  }
 0x13c   : > { %786 = vsyncadd (!%p652_p6), %s502_s5, 4294965248  ;;  %s16_s19 = sadd.s32 1, %s817_s19   ;;  %s1158_s12 = smov %s793_s13 }
 0x13d   : > { %p13_p7 = scmp.ge.s32.totalorder %s16_s19, 6   ;;  %s1159_s13 = smov %s797_s14 }
 0x13e   : > { %s1160_s14 = smov %s912_s30  ;;  %s1161_s15 = smov %s809_s17 }
 0x13f   : > { %s1162_s16 = smov %s813_s18  ;;  %s1163_s17 = smov %s1166_s22 }
 0x140   : > { %s1164_s18 = smov %s1170_s23  ;;  %15 = sbr.rel (!%p13_p7) target bundleno = 5 (0x5), region = 67 }
 0x147   :  { %507 = vsyncpa [#allocation3], 1 }
 0x148   :  { %509 = vsyncpa [#allocation3 + $0x1], 1 }

</bundles_post_ra>
